<compile_context>
chip_gen: v6e
topology: v6e:2x2x1
jax: 0.10.0
libtpu: 0.0.40
codegen_flags: <defaults>
</compile_context>

<pallas_src>
import functools

import jax
import jax.numpy as jnp
from jax.experimental import pallas as pl
from jax.experimental.pallas import tpu as pltpu


def _layernorm(z, gamma, beta, eps=1e-5):
    mu = jnp.mean(z, axis=-1, keepdims=True)
    var = jnp.mean((z - mu) ** 2, axis=-1, keepdims=True)
    return (z - mu) * jax.lax.rsqrt(var + eps) * gamma + beta


# ----------------------------------------------------------------------------
# Kernel 1: fused QKV projection — one lane-dense matmul per source-row block.
# ----------------------------------------------------------------------------
def _qkv_proj_kernel(x_ref, w_ref, b_ref, qkv_ref):
    qkv_ref[...] = (
        jnp.dot(x_ref[...].astype(jnp.bfloat16), w_ref[...],
                preferred_element_type=jnp.float32) + b_ref[...])


# ----------------------------------------------------------------------------
# Kernel 2: attention (precomputed Q/K/V + dense bf16 bias) + out-proj + LN +
# FFN + LN, gridded over query-row blocks.
# ----------------------------------------------------------------------------
def _attn_ffn_kernel(num_heads, head_dim,
                     x_ref, q_ref, k_ref, v_ref, bias_ref,
                     wo_ref, bo_ref,
                     g1_ref, beta1_ref, g2_ref, beta2_ref,
                     wf1_ref, bf1_ref, wf2_ref, bf2_ref,
                     out_ref):
    H, D = num_heads, head_dim
    xq = x_ref[...]                                   # (tq, C) f32 residual
    tq, C = xq.shape

    # Scores: bf16 operands, f32 accumulation.  Scale already folded into q.
    s = jnp.einsum('hqd,hkd->hqk', q_ref[...], k_ref[...],
                   preferred_element_type=jnp.float32)              # (H, tq, N)
    logits = s + bias_ref[...].astype(jnp.float32)                  # -1e30 at non-edges
    m = jnp.max(logits, axis=-1, keepdims=True)
    e = jnp.exp(logits - m)
    p = e * pl.reciprocal(jnp.sum(e, axis=-1, keepdims=True), approx=True)

    o3 = jnp.einsum('hqk,hkd->hqd', p.astype(jnp.bfloat16), v_ref[...],
                    preferred_element_type=jnp.float32)             # (H, tq, D)

    # Flatten heads along lanes (static per-head slices; matches PyTorch's
    # reshape(N, H*D) ordering) and do ONE deep (tq, C) @ (C, C) out-projection.
    o_flat = jnp.concatenate([o3[h] for h in range(H)], axis=-1)    # (tq, C)
    attn = jnp.dot(o_flat.astype(jnp.bfloat16), wo_ref[...],
                   preferred_element_type=jnp.float32) + bo_ref[...]

    x1 = _layernorm(xq + attn, g1_ref[...], beta1_ref[...])

    hdn = jnp.maximum(
        jnp.dot(x1.astype(jnp.bfloat16), wf1_ref[...],
                preferred_element_type=jnp.float32) + bf1_ref[...], 0.0)
    ffn = jnp.dot(hdn.astype(jnp.bfloat16), wf2_ref[...],
                  preferred_element_type=jnp.float32) + bf2_ref[...]
    out_ref[...] = _layernorm(x1 + ffn, g2_ref[...], beta2_ref[...])


def _vmem_limit_bytes(N, hidden, H, D, block_q):
    """Explicit VMEM budget (double-buffered tiles + pinned weights), v7x-safe."""
    f32, bf16 = 4, 2
    b = 0
    b += 2 * block_q * hidden * f32                 # x residual block
    b += 2 * H * block_q * D * bf16                 # q3 block
    b += 2 * 2 * H * N * D * bf16                   # k3 + v3 (pinned, default 2-buffered)
    b += 2 * H * block_q * N * bf16                 # bf16 bias tile
    b += 2 * block_q * hidden * f32                 # output block
    b += 2 * (hidden * hidden + 8 * hidden * hidden) * bf16   # wo, wf1, wf2
    b += 2 * 16 * hidden * f32                      # small f32 params
    est = int(1.5 * b) + (2 << 20)
    return max(16 << 20, min(48 << 20, est))        # stay well under v7x 64 MiB physical


def graphormer_layer(x, bias_dense, params, num_heads, block_q=256):
    """x: (N, hidden) f32; bias_dense: (H, N, N) bf16 with -1e30 at non-edges."""
    N, hidden = x.shape
    H = num_heads
    D = hidden // H
    bf16 = jnp.bfloat16

    block_q = min(block_q, N)
    assert N % block_q == 0
    assert block_q % 8 == 0 or block_q == N

    inv_sqrt_d = 1.0 / (D ** 0.5)
    # Fused QKV weight/bias; 1/sqrt(D) folded exactly into the Q columns (once).
    w_qkv = jnp.concatenate(
        [params['wq'] * inv_sqrt_d, params['wk'], params['wv']], axis=1).astype(bf16)
    b_qkv = jnp.concatenate(
        [params['bq'] * inv_sqrt_d, params['bk'], params['bv']], axis=1)      # f32

    # ---- Pass 1: QKV projection (computed ONCE, not per query block) ----
    block_src = min(512, N)
    assert N % block_src == 0
    qkv = pl.pallas_call(
        _qkv_proj_kernel,
        out_shape=jax.ShapeDtypeStruct((N, 3 * hidden), jnp.float32),
        grid=(N // block_src,),
        in_specs=[pl.BlockSpec((block_src, hidden), lambda i: (i, 0)),
                  pl.BlockSpec((hidden, 3 * hidden), lambda i: (0, 0)),
                  pl.BlockSpec((1, 3 * hidden), lambda i: (0, 0))],
        out_specs=pl.BlockSpec((block_src, 3 * hidden), lambda i: (i, 0)),
        compiler_params=pltpu.CompilerParams(dimension_semantics=("parallel",)),
    )(x, w_qkv, b_qkv)

    # Heads-leading bf16 layouts (plain XLA glue, done once, O(N*hidden)).
    q3 = qkv[:, :hidden].reshape(N, H, D).transpose(1, 0, 2).astype(bf16)      # (H, N, D)
    k3 = qkv[:, hidden:2 * hidden].reshape(N, H, D).transpose(1, 0, 2).astype(bf16)
    v3 = qkv[:, 2 * hidden:].reshape(N, H, D).transpose(1, 0, 2).astype(bf16)

    wo = params['wo'].astype(bf16)
    wf1 = params['wf1'].astype(bf16)
    wf2 = params['wf2'].astype(bf16)

    kernel = functools.partial(_attn_ffn_kernel, H, D)

    row_map = lambda i: (i, 0)
    pin2 = lambda i: (0, 0)           # constant index_map: DMA once, stays resident
    pin3 = lambda i: (0, 0, 0)
    hrow_map = lambda i: (0, i, 0)

    in_specs = [
        pl.BlockSpec((block_q, hidden), row_map),       # x residual rows
        pl.BlockSpec((H, block_q, D), hrow_map),        # q3 block (bf16)
        pl.BlockSpec((H, N, D), pin3),                  # k3 (pinned)
        pl.BlockSpec((H, N, D), pin3),                  # v3 (pinned)
        pl.BlockSpec((H, block_q, N), hrow_map),        # bf16 bias tile (streamed)
        pl.BlockSpec((hidden, hidden), pin2),           # wo
        pl.BlockSpec((1, hidden), pin2),                # bo
        pl.BlockSpec((1, hidden), pin2),                # g1
        pl.BlockSpec((1, hidden), pin2),                # beta1
        pl.BlockSpec((1, hidden), pin2),                # g2
        pl.BlockSpec((1, hidden), pin2),                # beta2
        pl.BlockSpec((hidden, 4 * hidden), pin2),       # wf1
        pl.BlockSpec((1, 4 * hidden), pin2),            # bf1
        pl.BlockSpec((4 * hidden, hidden), pin2),       # wf2
        pl.BlockSpec((1, hidden), pin2),                # bf2
    ]

    # ---- Pass 2: attention + out-proj + LN + FFN + LN over query blocks ----
    return pl.pallas_call(
        kernel,
        out_shape=jax.ShapeDtypeStruct((N, hidden), jnp.float32),
        grid=(N // block_q,),
        in_specs=in_specs,
        out_specs=pl.BlockSpec((block_q, hidden), row_map),
        compiler_params=pltpu.CompilerParams(
            dimension_semantics=("parallel",),
            vmem_limit_bytes=_vmem_limit_bytes(N, hidden, H, D, block_q)),
    )(x, q3, k3, v3, bias_dense, wo, params['bo'],
      params['g1'], params['beta1'], params['g2'], params['beta2'],
      wf1, params['bf1'], wf2, params['bf2'])


def build_attn_bias(edge_index, edge_attr, we, be, num_heads, N):
    # TODO(synk): the sparse per-edge scatter into dense (H, N, N) logits (and an
    # edge-driven kv-block flash grid for large N) stays in plain JAX glue.
    edge_bias = edge_attr @ we + be                                  # (E, H)
    src, dst = edge_index[0], edge_index[1]
    # Finite large-negative mask (NOT -inf): an all-masked row softmaxes to a finite
    # uniform distribution instead of NaN.  -1e30 is representable in bf16.
    bias = jnp.full((num_heads, N, N), -1e30, dtype=jnp.float32)
    bias = bias.at[:, src, dst].set(edge_bias.T)
    return bias.astype(jnp.bfloat16)   # halves the only O(N^2) HBM stream


def reference(x, edge_index, edge_attr, params, num_heads):
    """Pure-JAX f32 mirror of the PyTorch forward for verification."""
    N, hidden = x.shape
    D = hidden // num_heads
    q = (x @ params['wq'] + params['bq']).reshape(N, num_heads, D)
    k = (x @ params['wk'] + params['bk']).reshape(N, num_heads, D)
    v = (x @ params['wv'] + params['bv']).reshape(N, num_heads, D)
    src, dst = edge_index[0], edge_index[1]
    edge_bias = edge_attr @ params['we'] + params['be']              # (E, H)
    dot = jnp.sum(q[src] * k[dst], axis=-1) / (D ** 0.5)             # (E, H)
    total = dot + edge_bias
    logits = jnp.full((num_heads, N, N), -jnp.inf, dtype=jnp.float32)
    logits = logits.at[:, src, dst].set(total.T)
    attn = jax.nn.softmax(logits, axis=-1)
    out = jnp.einsum('hnm,mhd->nhd', attn, v).reshape(N, hidden)
    out = out @ params['wo'] + params['bo']
    x1 = _layernorm(x + out, params['g1'], params['beta1'])
    ffn = jnp.maximum(x1 @ params['wf1'] + params['bf1'], 0.0) @ params['wf2'] + params['bf2']
    return _layernorm(x1 + ffn, params['g2'], params['beta2'])


if __name__ == "__main__":
    N, hidden_dim, edge_dim, num_heads = 16, 48, 8, 3

    key = jax.random.PRNGKey(0)
    ks = jax.random.split(key, 16)

    x = jax.random.normal(ks[0], (N, hidden_dim), jnp.float32)

    # Edges: self-loops + a ring (unique edges; every node has >=1 outgoing edge so
    # no softmax row is fully masked).
    nodes = jnp.arange(N, dtype=jnp.int32)
    src = jnp.concatenate([nodes, nodes])
    dst = jnp.concatenate([nodes, (nodes + 1) % N])
    edge_index = jnp.stack([src, dst])                               # (2, 2N)
    E = edge_index.shape[1]
    edge_attr = jax.random.normal(ks[1], (E, edge_dim), jnp.float32)

    def init(k, shape, scale=0.1):
        return scale * jax.random.normal(k, shape, jnp.float32)

    params = dict(
        wq=init(ks[2], (hidden_dim, hidden_dim)), bq=init(ks[3], (1, hidden_dim)),
        wk=init(ks[4], (hidden_dim, hidden_dim)), bk=init(ks[5], (1, hidden_dim)),
        wv=init(ks[6], (hidden_dim, hidden_dim)), bv=init(ks[7], (1, hidden_dim)),
        wo=init(ks[8], (hidden_dim, hidden_dim)), bo=init(ks[9], (1, hidden_dim)),
        we=init(ks[10], (edge_dim, num_heads)),   be=init(ks[11], (1, num_heads)),
        g1=jnp.ones((1, hidden_dim), jnp.float32), beta1=jnp.zeros((1, hidden_dim), jnp.float32),
        g2=jnp.ones((1, hidden_dim), jnp.float32), beta2=jnp.zeros((1, hidden_dim), jnp.float32),
        wf1=init(ks[12], (hidden_dim, 4 * hidden_dim)), bf1=init(ks[13], (1, 4 * hidden_dim)),
        wf2=init(ks[14], (4 * hidden_dim, hidden_dim)), bf2=init(ks[15], (1, hidden_dim)),
    )

    bias_dense = build_attn_bias(edge_index, edge_attr, params['we'], params['be'],
                                 num_heads, N)

    out = graphormer_layer(x, bias_dense, params, num_heads=num_heads, block_q=256)
    out = jax.block_until_ready(out)

    ref = jax.block_until_ready(reference(x, edge_index, edge_attr, params, num_heads))

    assert out.shape == (N, hidden_dim)
    assert bool(jnp.all(jnp.isfinite(out)))
    # bf16 MXU operands / bf16 bias (f32 accumulation) vs the pure-f32 reference.
    assert bool(jnp.allclose(out, ref, atol=5e-2, rtol=5e-2)), (
        f"max abs err {float(jnp.max(jnp.abs(out - ref)))}")

    print("KERNEL_OK")
</pallas_src>

<mosaic_0001>
module attributes {stable_mosaic.version = 11 : i64} {
  func.func @_qkv_proj_kernel(%arg0: i32, %arg1: memref<16x48xf32, #tpu.memory_space<vmem>>, %arg2: memref<48x144xbf16, #tpu.memory_space<vmem>>, %arg3: memref<1x144xf32, #tpu.memory_space<vmem>>, %arg4: memref<16x144xf32, #tpu.memory_space<vmem>>) attributes {dimension_semantics = [#tpu.dimension_semantics<parallel>], iteration_bounds = array<i64: 1>, scalar_prefetch = 0 : i64, scratch_operands = 0 : i64, tpu.core_type = #tpu.core_type<tc>, window_params = [{transform_indices = @transform_0, window_bounds = array<i64: 16, 48>}, {pipeline_mode = #tpu.pipeline_mode<synchronous>, transform_indices = @transform_1, window_bounds = array<i64: 48, 144>}, {pipeline_mode = #tpu.pipeline_mode<synchronous>, transform_indices = @transform_2, window_bounds = array<i64: 1, 144>}, {transform_indices = @transform_3, window_bounds = array<i64: 16, 144>}]} {
    %c0 = arith.constant 0 : index
    %c0_0 = arith.constant 0 : index
    %0 = vector.load %arg1[%c0, %c0_0] : memref<16x48xf32, #tpu.memory_space<vmem>>, vector<16x48xf32>
    %1 = arith.truncf %0 : vector<16x48xf32> to vector<16x48xbf16>
    %c0_1 = arith.constant 0 : index
    %c0_2 = arith.constant 0 : index
    %2 = vector.load %arg2[%c0_1, %c0_2] : memref<48x144xbf16, #tpu.memory_space<vmem>>, vector<48x144xbf16>
    %cst = arith.constant dense<0.000000e+00> : vector<16x144xf32>
    %3 = tpu.matmul %1, %2, %cst {dimension_numbers = #tpu.dot_dimension_numbers<[1], [0], [0], [1], [0, 0, 1, 1], [], []>} : vector<16x48xbf16>, vector<48x144xbf16>, vector<16x144xf32> -> vector<16x144xf32>
    %c0_3 = arith.constant 0 : index
    %c0_4 = arith.constant 0 : index
    %4 = vector.load %arg3[%c0_3, %c0_4] : memref<1x144xf32, #tpu.memory_space<vmem>>, vector<1x144xf32>
    %5 = vector.broadcast %4 : vector<1x144xf32> to vector<16x144xf32>
    %6 = arith.addf %3, %5 : vector<16x144xf32>
    %c0_5 = arith.constant 0 : index
    %c0_6 = arith.constant 0 : index
    %7 = vector.load %arg4[%c0_5, %c0_6] : memref<16x144xf32, #tpu.memory_space<vmem>>, vector<16x144xf32>
    tpu.vector_store %arg4[%c0_5, %c0_6], %6 {strides = array<i32>} : memref<16x144xf32, #tpu.memory_space<vmem>>, vector<16x144xf32>,
    return
  }
  func.func @transform_0(%arg0: i32) -> (i32, i32) {
    %c0_i32 = arith.constant 0 : i32
    %c0_i32_0 = arith.constant 0 : i32
    return %arg0, %c0_i32 : i32, i32
  }
  func.func @transform_1(%arg0: i32) -> (i32, i32) {
    %c0_i32 = arith.constant 0 : i32
    %c0_i32_0 = arith.constant 0 : i32
    %c0_i32_1 = arith.constant 0 : i32
    return %c0_i32, %c0_i32_0 : i32, i32
  }
  func.func @transform_2(%arg0: i32) -> (i32, i32) {
    %c0_i32 = arith.constant 0 : i32
    %c0_i32_0 = arith.constant 0 : i32
    %c0_i32_1 = arith.constant 0 : i32
    return %c0_i32, %c0_i32_0 : i32, i32
  }
  func.func @transform_3(%arg0: i32) -> (i32, i32) {
    %c0_i32 = arith.constant 0 : i32
    %c0_i32_0 = arith.constant 0 : i32
    return %arg0, %c0_i32 : i32, i32
  }
}

</mosaic_0001>

<bundles_post_ra>
// kernel: tpu_custom_call.1
= control target key start
LH: loop header
LB: loop body
LE: loop exit
PB: predicated region body
PF: predicated region fallthrough
CT: control target
= control target key end

     0   :  { %8 = vsyncpa [#allocation3], 0  ;;  %s295_s0 = inlined_call_operand.hbm [shape: f32[16,48], index: 0, kind: input, shape index: {}]   ;;  %s296_s1 = inlined_call_operand.hbm [shape: bf16[48,144], index: 1, kind: input, shape index: {}]   ;;  %s297_s2 = inlined_call_operand.vmem [shape: f32[1,144], index: 2, kind: input, shape index: {}]   ;;  %s298_s3 = inlined_call_operand.hbm [shape: f32[16,144], index: 3, kind: output, shape index: {}]  }
   0x1   :  { %9 = vsyncpa [#allocation6], 0 }
   0x2   :  { %10 = vsyncpa [#allocation4], 0  ;;  %s255_s12 = smov [#allocation2]  }
   0x3   :  { %s16_s13 = sshll.u32 %s255_s12, 4  ;;  %s17_s13 = int_to_ptr.vmem [resolvable:$true] %s16_s13 }
   0x4   :  { %s197_s14 = scalar_lea.vmem %s17_s13, 256  ;;  %p202_p1 = scmp.lt.s32.totalorder %s17_s13, %s17_s13 }
   0x5   :  { %p198_p0 = scmp.ne.s32.totalorder %s17_s13, %s197_s14  ;;  %p203_p2 = scmp.lt.s32.totalorder %s197_s14, %s197_s14 }
   0x7   :  { %p204_p3 = por %p203_p2, %p202_p1 }
   0x9   :  { %p205_p4 = pnand %p204_p3, %p198_p0 }
   0xb   :  { %208 = shalt.err (!%p205_p4)
}
   0xc   :  { %s256_s15 = smov 128   ;;  %s257_s16 = smov 8  }
   0xd   :  { %22 = dma.hbm_to_vmem [thread:$0]  %s295_s0, 256, %s17_s13, [#allocation3], %s256_s15, %s256_s15, %s257_s16  }
   0xe   :  { %s258_s19 = smov [#allocation5]  }
   0xf   :  { %s28_s20 = sshll.u32 %s258_s19, 4  ;;  %s29_s20 = int_to_ptr.vmem [resolvable:$true] %s28_s20 }
  0x10   :  { %s217_s21 = scalar_lea.vmem %s29_s20, 768  ;;  %p222_p6 = scmp.lt.s32.totalorder %s29_s20, %s29_s20 }
  0x11   :  { %p218_p5 = scmp.ne.s32.totalorder %s29_s20, %s217_s21  ;;  %p223_p7 = scmp.lt.s32.totalorder %s217_s21, %s217_s21 }
  0x13   :  { %p224_p8 = por %p223_p7, %p222_p6 }
  0x15   :  { %p225_p9 = pnand %p224_p8, %p218_p5 }
  0x17   :  { %228 = shalt.err (!%p225_p9)
}
  0x18   :  { %34 = dma.hbm_to_vmem [thread:$0]  %s296_s1, 768, %s29_s20, [#allocation6], %s256_s15, %s256_s15, %s257_s16  }
  0x19   :  { %249 = dma.done.wait [#allocation3], 256  }
  0x1a   :  { %250 = vsyncadd [#allocation3], 4294967040 }
  0x1b   :  { %251 = dma.done.wait [#allocation6], 768  }
  0x1c   :  { %252 = vsyncadd [#allocation6], 4294966528  ;;  %v259_v0 = vmov 0   ;;  %v180_v1 = vld [vmem:[#allocation5 + $0x24] ss:$8 sps:$4 sm:$0xff]   ;;  %v44_v7 = vld [vmem:[#allocation2] sm:$0xff]  ;;  %v55_v10 = vlaneseq }
  0x1d   :  { %131 = vmatprep.mubr.bf16.mxu0 %v259_v0  ;;  %v182_v2 = vld [vmem:[#allocation5 + $0x20] ss:$8 sps:$4 sm:$0xff]   ;;  %109 = vmatprep.subr.bf16.mxu0 %v180_v1  ;;  %v183_v3 = vld [vmem:[#allocation5 + $0x14] ss:$8 sps:$4 sm:$0xff]   ;;  %v185_v4 = vld [vmem:[#allocation5 + $0x10] ss:$8 sps:$4 sm:$0xff]  }
  0x1e   :  { %110 = vmatpush1.bf16.msra.mxu0 %v182_v2  ;;  %v186_v5 = vld [vmem:[#allocation5 + $0x4] ss:$8 sps:$4 sm:$0xff]   ;;  %v188_v6 = vld [vmem:[#allocation5] ss:$8 sps:$4 sm:$0xff]   ;;  %v45_v8 = vld [vmem:[#allocation2 + $0x8] sm:$0xff]  ;;  %vm95_vm0 = vcmask 392192  }
  0x1f   :  { %111 = vmatprep.subr.bf16.mxu0 %v183_v3  ;;  %v46_v9 = vpack.c.bf16 %v45_v8, %v44_v7  ;;  %v56_v11 = vshrl.u32 %v55_v10, 7  ;;  %v53_v13 = vld [vmem:[%s297_s2] sm:$0x3]  ;;  %vm143_vm1 = vcmask 130048   ;;  %s260_s24 = smov [#allocation7]  }
  0x20   :  { %s152_s25 = sshll.u32 %s260_s24, 4  ;;  %s153_s25 = int_to_ptr.vmem [resolvable:$true] %s152_s25 }
  0x21   :  { %v57_v12 = vsub.s32 0, %v56_v11  ;;  %v61_v14 = vsub.s32 1, %v56_v11  ;;  %s229_s2 = scalar_lea.vmem %s153_s25, 512  ;;  %p234_p11 = scmp.lt.s32.totalorder %s153_s25, %s153_s25 }
  0x22   :  { %112 = vmatpush1.bf16.msra.mxu0 %v185_v4  ;;  %p230_p10 = scmp.ne.s32.totalorder %s153_s25, %s229_s2  ;;  %p235_p12 = scmp.lt.s32.totalorder %s229_s2, %s229_s2 }
  0x23   :  { %113 = vmatprep.subr.bf16.mxu0 %v186_v5  ;;  %v58_v15 = vrot.slane %v53_v13, %v57_v12  ;;  %v62_v16 = vrot.slane %v53_v13, %v61_v14 }
  0x24   :  { %p236_p13 = por %p235_p12, %p234_p11 }
  0x26   :  { %114 = vmatpush1.bf16.msra.mxu0 %v188_v6  ;;  %p237_p0 = pnand %p236_p13, %p230_p10 }
  0x29   :  { %171 = vmatmul.mubr.msk.bf16.vlgmr.msra.gmra.mxu0 %vm95_vm0, %v46_v9 }
  0xe9   :  { %v133_v17 = vpop.f32.mrf.mxu0 }
  0xea   :  { %v134_v18 = vadd.f32 %v133_v17, %v58_v15 }
  0xeb   :  { %v135_v19 = vpop.f32.mrf.mxu0 }
  0xec   :  { %142 = vst [vmem:[#allocation7] sm:$0xff] %v134_v18  ;;  %v136_v20 = vadd.f32 %v135_v19, %v62_v16 }
  0xed   :  { %v137_v21 = vpop.f32.mrf.mxu0 }
  0xee   :  { %144 = vst.msk [vmem:[#allocation7 + $0x8] sm:$0xff] %vm143_vm1, %v136_v20  ;;  %v138_v22 = vadd.f32 %v137_v21, %v58_v15 }
  0xef   :  { %v139_v23 = vpop.f32.mrf.mxu0 }
  0xf0   :  { %145 = vst [vmem:[#allocation7 + $0x10] sm:$0xff] %v138_v22  ;;  %v140_v24 = vadd.f32 %v139_v23, %v62_v16 }
  0xf2   :  { %146 = vst.msk [vmem:[#allocation7 + $0x18] sm:$0xff] %vm143_vm1, %v140_v24 }
  0xf3   :  { %240 = shalt.err (!%p237_p0)
}
  0xf4   :  { %s261_s26 = smov 256   ;;  %s262_s27 = smov 16  }
  0xf5   :  { %158 = dma.vmem_to_hbm [thread:$0]  %s153_s25, 512, %s298_s3, [#allocation4], %s261_s26, %s261_s26, %s262_s27  }
  0xf6   :  { %253 = dma.done.wait [#allocation4], 512  }
  0xf7   :  { %254 = vsyncadd [#allocation4], 4294966784 }
  0xf8   :  { %162 = vsyncpa [#allocation3], 1 }
  0xf9   :  { %163 = vsyncpa [#allocation6], 1 }
  0xfa   :  { %164 = vsyncpa [#allocation4], 1 }

</bundles_post_ra>
